<compile_context>
chip_gen: v5e
topology: v5e:2x2
jax: 0.10.0
libtpu: 0.0.40
codegen_flags: <defaults>
</compile_context>

<pallas_src>
import jax
import jax.numpy as jnp
from jax import lax
from jax.experimental import pallas as pl
from jax.experimental.pallas import tpu as pltpu


def _discriminator_kernel(x_ref, w1_ref, b1_ref, w2_ref, b2_ref, o_ref):
    # x_ref:  (TB, D)  activations (f32 or bf16)
    # w1_ref: (D, D)   dense weight, PyTorch [out, in] layout (same dtype as x)
    # b1_ref: (1, D)   dense bias (f32)
    # w2_ref: (1, D)   output weight [1, in] (f32)
    # b2_ref: (1, 1)   output bias, SMEM scalar (f32)
    # o_ref:  (1, TB)  lane-dense output tile (f32)

    # dense(x) = x @ W1^T, contracted directly against the [out, in] layout
    # (no materialized transpose); accumulate in f32 regardless of input dtype.
    h = lax.dot_general(
        x_ref[...], w1_ref[...],
        dimension_numbers=(((1,), (1,)), ((), ())),
        preferred_element_type=jnp.float32,
    )
    h = jnp.maximum(h + b1_ref[...], 0.0)          # bias bcast over rows + ReLU (f32 VPU)

    # output(h) = W2 @ h^T -> (1, TB): output tile is lane-dense, so the store is a
    # plain unmasked vst instead of TB/8 masked single-lane stores.
    y = lax.dot_general(
        w2_ref[...], h,
        dimension_numbers=(((1,), (1,)), ((), ())),
        preferred_element_type=jnp.float32,
    )
    t = y + b2_ref[0, 0]                            # SMEM scalar bias

    # Exact sigmoid; exp rides the EUP which is idle in this mem-bound kernel.
    o_ref[...] = (1.0 / (1.0 + jnp.exp(-t))).astype(o_ref.dtype)


def _round_up(n, m):
    return ((n + m - 1) // m) * m


def discriminator_forward(x, w1, b1, w2, b2, *, max_block_b=16384,
                          cast_inputs_to_bf16=False):
    """x: (B, D) f32; w1: (D, D) [out,in]; b1: (D,); w2: (1, D); b2: (1,). Returns (B, 1)."""
    B, D = x.shape
    assert w1.shape == (D, D) and b1.shape == (D,)
    assert w2.shape == (1, D) and b2.shape == (1,)

    # --- batch tiling --------------------------------------------------------
    # Pure HBM streaming of x (D*4 B per row): use the biggest sensible tile.
    # Small B -> single grid step (whole batch resident); large B -> multi-MiB
    # tiles (multiple of 128 rows => lane-dense output blocks) with the ragged
    # tail zero-padded in the wrapper (never a giant fallback block).
    row_align = 16  # bf16 sublane packing; also a multiple of 8 for f32
    if B <= max_block_b:
        tb = _round_up(B, row_align)
        b_pad = tb
    else:
        tb = _round_up(max_block_b, 128)
        b_pad = _round_up(B, tb)
    grid = (b_pad // tb,)

    if b_pad != B:
        x = jnp.pad(x, ((0, b_pad - B), (0, 0)))

    # Optional bf16 x / w1 stream (halves HBM bytes; big win on v5e's ~0.8 TB/s).
    # MXU accumulation stays f32 via preferred_element_type; epilogue stays f32.
    if cast_inputs_to_bf16:
        x = x.astype(jnp.bfloat16)
        w1 = w1.astype(jnp.bfloat16)

    b1_2 = b1.reshape(1, D).astype(jnp.float32)
    w2_2 = w2.astype(jnp.float32)
    b2_2 = b2.reshape(1, 1).astype(jnp.float32)

    out = pl.pallas_call(
        _discriminator_kernel,
        out_shape=jax.ShapeDtypeStruct((1, b_pad), jnp.float32),
        grid_spec=pltpu.PrefetchScalarGridSpec(
            num_scalar_prefetch=0,
            grid=grid,
            in_specs=[
                pl.BlockSpec((tb, D), lambda i: (i, 0)),   # x: streamed over batch
                pl.BlockSpec((D, D), lambda i: (0, 0)),    # w1: VMEM-resident
                pl.BlockSpec((1, D), lambda i: (0, 0)),    # b1: VMEM-resident
                pl.BlockSpec((1, D), lambda i: (0, 0)),    # w2: VMEM-resident
                pl.BlockSpec(memory_space=pltpu.MemorySpace.SMEM),  # b2: SMEM scalar
            ],
            out_specs=pl.BlockSpec((1, tb), lambda i: (0, i)),      # lane-dense store
        ),
        compiler_params=pltpu.CompilerParams(
            # batch tiles are independent -> shardable across v7x's 2 TensorCores
            dimension_semantics=("parallel",),
            # insurance for very large tiles on v5e's 16 MiB scoped-VMEM default
            vmem_limit_bytes=32 * 1024 * 1024,
        ),
    )(x, w1, b1_2, w2_2, b2_2)

    # (1, B_pad) lane-dense kernel output -> (B, 1) module output (free layout plumbing).
    return out[0, :B].reshape(B, 1)


if __name__ == "__main__":
    input_length = 32

    key = jax.random.PRNGKey(0)
    k_x, k_w1, k_b1, k_w2, k_b2, k_x2 = jax.random.split(key, 6)

    # Deterministic init mimicking nn.Linear default U(-1/sqrt(in), 1/sqrt(in)).
    bound = 1.0 / jnp.sqrt(jnp.float32(input_length))
    w1 = jax.random.uniform(k_w1, (input_length, input_length), jnp.float32, -bound, bound)
    b1 = jax.random.uniform(k_b1, (input_length,), jnp.float32, -bound, bound)
    w2 = jax.random.uniform(k_w2, (1, input_length), jnp.float32, -bound, bound)
    b2 = jax.random.uniform(k_b2, (1,), jnp.float32, -bound, bound)

    def reference(xx):
        h = jnp.maximum(xx @ w1.T + b1, 0.0)
        return jax.nn.sigmoid(h @ w2.T + b2)

    # Case 1: small batch -> single grid step, whole batch resident.
    batch = 128
    x = jax.random.normal(k_x, (batch, input_length), jnp.float32)
    out = jax.block_until_ready(discriminator_forward(x, w1, b1, w2, b2))
    assert out.shape == (batch, 1)
    ref = reference(x)
    assert jnp.allclose(out, ref, atol=1e-5, rtol=1e-5), float(jnp.max(jnp.abs(out - ref)))

    # Case 2: ragged batch forced onto the multi-tile path (zero-pad + grid=(2,)).
    batch2 = 200
    x2 = jax.random.normal(k_x2, (batch2, input_length), jnp.float32)
    out2 = jax.block_until_ready(
        discriminator_forward(x2, w1, b1, w2, b2, max_block_b=100))
    assert out2.shape == (batch2, 1)
    ref2 = reference(x2)
    assert jnp.allclose(out2, ref2, atol=1e-5, rtol=1e-5), float(jnp.max(jnp.abs(out2 - ref2)))

    # Case 3: bf16 x/w1 stream (the v5e bandwidth optimization), f32 accumulation.
    out3 = jax.block_until_ready(
        discriminator_forward(x, w1, b1, w2, b2, cast_inputs_to_bf16=True))
    assert jnp.allclose(out3, ref, atol=2e-2, rtol=2e-2), float(jnp.max(jnp.abs(out3 - ref)))

    print("KERNEL_OK")
</pallas_src>

<mosaic_0001>
module attributes {stable_mosaic.version = 11 : i64} {
  func.func @_discriminator_kernel(%arg0: i32, %arg1: memref<128x32xf32, #tpu.memory_space<vmem>>, %arg2: memref<32x32xf32, #tpu.memory_space<vmem>>, %arg3: memref<1x32xf32, #tpu.memory_space<vmem>>, %arg4: memref<1x32xf32, #tpu.memory_space<vmem>>, %arg5: memref<1x1xf32, #tpu.memory_space<smem>>, %arg6: memref<1x128xf32, #tpu.memory_space<vmem>>) attributes {dimension_semantics = [#tpu.dimension_semantics<parallel>], iteration_bounds = array<i64: 1>, scalar_prefetch = 0 : i64, scratch_operands = 0 : i64, tpu.core_type = #tpu.core_type<tc>, window_params = [{transform_indices = @transform_0, window_bounds = array<i64: 128, 32>}, {pipeline_mode = #tpu.pipeline_mode<synchronous>, transform_indices = @transform_1, window_bounds = array<i64: 32, 32>}, {pipeline_mode = #tpu.pipeline_mode<synchronous>, transform_indices = @transform_2, window_bounds = array<i64: 1, 32>}, {pipeline_mode = #tpu.pipeline_mode<synchronous>, transform_indices = @transform_3, window_bounds = array<i64: 1, 32>}, {transform_indices = @transform_4, window_bounds = array<i64: 1, 1>}, {transform_indices = @transform_5, window_bounds = array<i64: 1, 128>}]} {
    %c0 = arith.constant 0 : index
    %c0_0 = arith.constant 0 : index
    %0 = vector.load %arg1[%c0, %c0_0] : memref<128x32xf32, #tpu.memory_space<vmem>>, vector<128x32xf32>
    %c0_1 = arith.constant 0 : index
    %c0_2 = arith.constant 0 : index
    %1 = vector.load %arg2[%c0_1, %c0_2] : memref<32x32xf32, #tpu.memory_space<vmem>>, vector<32x32xf32>
    %cst = arith.constant dense<0.000000e+00> : vector<128x32xf32>
    %2 = tpu.matmul %0, %1, %cst {dimension_numbers = #tpu.dot_dimension_numbers<[1], [1], [0], [0], [0, 0, 1, 0], [], []>} : vector<128x32xf32>, vector<32x32xf32>, vector<128x32xf32> -> vector<128x32xf32>
    %c0_3 = arith.constant 0 : index
    %c0_4 = arith.constant 0 : index
    %3 = vector.load %arg3[%c0_3, %c0_4] : memref<1x32xf32, #tpu.memory_space<vmem>>, vector<1x32xf32>
    %4 = vector.broadcast %3 : vector<1x32xf32> to vector<128x32xf32>
    %5 = arith.addf %2, %4 : vector<128x32xf32>
    %cst_5 = arith.constant 0.000000e+00 : f32
    %6 = vector.broadcast %cst_5 : f32 to vector<128x32xf32>
    %7 = arith.maximumf %5, %6 : vector<128x32xf32>
    %c0_6 = arith.constant 0 : index
    %c0_7 = arith.constant 0 : index
    %8 = vector.load %arg4[%c0_6, %c0_7] : memref<1x32xf32, #tpu.memory_space<vmem>>, vector<1x32xf32>
    %cst_8 = arith.constant dense<0.000000e+00> : vector<1x128xf32>
    %9 = tpu.matmul %8, %7, %cst_8 {dimension_numbers = #tpu.dot_dimension_numbers<[1], [1], [0], [0], [0, 0, 1, 0], [], []>} : vector<1x32xf32>, vector<128x32xf32>, vector<1x128xf32> -> vector<1x128xf32>
    %c0_9 = arith.constant 0 : index
    %c0_10 = arith.constant 0 : index
    %10 = memref.load %arg5[%c0_9, %c0_10] : memref<1x1xf32, #tpu.memory_space<smem>>
    %11 = vector.broadcast %10 : f32 to vector<1x128xf32>
    %12 = arith.addf %9, %11 : vector<1x128xf32>
    %cst_11 = arith.constant 0.000000e+00 : f32
    %13 = vector.broadcast %cst_11 : f32 to vector<1x128xf32>
    %14 = arith.subf %13, %12 : vector<1x128xf32>
    %15 = math.exp %14 : vector<1x128xf32>
    %cst_12 = arith.constant 1.000000e+00 : f32
    %16 = vector.broadcast %cst_12 : f32 to vector<1x128xf32>
    %17 = arith.addf %16, %15 : vector<1x128xf32>
    %cst_13 = arith.constant 1.000000e+00 : f32
    %18 = vector.broadcast %cst_13 : f32 to vector<1x128xf32>
    %19 = arith.divf %18, %17 : vector<1x128xf32>
    %c0_14 = arith.constant 0 : index
    %c0_15 = arith.constant 0 : index
    %20 = vector.load %arg6[%c0_14, %c0_15] : memref<1x128xf32, #tpu.memory_space<vmem>>, vector<1x128xf32>
    tpu.vector_store %arg6[%c0_14, %c0_15], %19 {strides = array<i32>} : memref<1x128xf32, #tpu.memory_space<vmem>>, vector<1x128xf32>,
    return
  }
  func.func @transform_0(%arg0: i32) -> (i32, i32) {
    %c0_i32 = arith.constant 0 : i32
    %c0_i32_0 = arith.constant 0 : i32
    return %arg0, %c0_i32 : i32, i32
  }
  func.func @transform_1(%arg0: i32) -> (i32, i32) {
    %c0_i32 = arith.constant 0 : i32
    %c0_i32_0 = arith.constant 0 : i32
    %c0_i32_1 = arith.constant 0 : i32
    return %c0_i32, %c0_i32_0 : i32, i32
  }
  func.func @transform_2(%arg0: i32) -> (i32, i32) {
    %c0_i32 = arith.constant 0 : i32
    %c0_i32_0 = arith.constant 0 : i32
    %c0_i32_1 = arith.constant 0 : i32
    return %c0_i32, %c0_i32_0 : i32, i32
  }
  func.func @transform_3(%arg0: i32) -> (i32, i32) {
    %c0_i32 = arith.constant 0 : i32
    %c0_i32_0 = arith.constant 0 : i32
    %c0_i32_1 = arith.constant 0 : i32
    return %c0_i32, %c0_i32_0 : i32, i32
  }
  func.func @transform_4(%arg0: i32) -> (i32, i32) {
    %c0_i32 = arith.constant 0 : i32
    %c0_i32_0 = arith.constant 0 : i32
    %c0_i32_1 = arith.constant 0 : i32
    return %c0_i32, %c0_i32_0 : i32, i32
  }
  func.func @transform_5(%arg0: i32) -> (i32, i32) {
    %c0_i32 = arith.constant 0 : i32
    %c0_i32_0 = arith.constant 0 : i32
    return %c0_i32, %arg0 : i32, i32
  }
}

</mosaic_0001>

<bundles_post_ra>
// kernel: tpu_custom_call.1
= control target key start
LH: loop header
LB: loop body
LE: loop exit
PB: predicated region body
PF: predicated region fallthrough
CT: control target
= control target key end

     0   :  { %vm46_vm0 = vcmask 261120   ;;  %s523_s0 = inlined_call_operand.vmem [shape: f32[128,32], index: 0, kind: input, shape index: {}]   ;;  %s524_s1 = inlined_call_operand.vmem [shape: f32[32,32], index: 1, kind: input, shape index: {}]   ;;  %s525_s2 = inlined_call_operand.vmem [shape: f32[1,32], index: 2, kind: input, shape index: {}]   ;;  %s526_s3 = inlined_call_operand.vmem [shape: f32[1,32], index: 3, kind: input, shape index: {}]   ;;  %s527_s4 = inlined_call_operand.<no memory space> [shape: f32[1,1], index: 4, kind: input, shape index: {}]   ;;  %s528_s5 = inlined_call_operand.hbm [shape: f32[1,128], index: 5, kind: output, shape index: {}]  }
   0x1   :  { %v41_v0 = vld [vmem:[%s524_s1 + $0x18] sm:$0xff]  ;;  %v40_v1 = vld [vmem:[%s524_s1 + $0x10] sm:$0xff] }
   0x2   :  { %335 = vmatpush.xpose.msk.msra.mxu2 %vm46_vm0, %v41_v0  ;;  %336 = vmatpush.xpose.msk.msra.mxu3 %vm46_vm0, %v41_v0 }
   0x3   :  { %298 = vmatpush.xpose.msk.msra.mxu0 %vm46_vm0, %v41_v0 }
   0x4   :  { %11 = vsyncpa [#allocation4], 0  ;;  %v39_v2 = vld [vmem:[%s524_s1 + $0x8] sm:$0xff]  ;;  %v38_v3 = vld [vmem:[%s524_s1] sm:$0xff] }
   0x5   :  { %v28_v4 = vld [vmem:[%s523_s0 + $0x30] sm:$0xff]  ;;  %v34_v5 = vld [vmem:[%s523_s0 + $0x60] sm:$0xff]  ;;  %v29_v7 = vld [vmem:[%s523_s0 + $0x38] sm:$0xff] }
   0x6   :  { %337 = vmatpush.xpose.msk.msra.mxu2 %vm46_vm0, %v40_v1  ;;  %338 = vmatpush.xpose.msk.msra.mxu3 %vm46_vm0, %v40_v1  ;;  %v22_v6 = vld [vmem:[%s523_s0] sm:$0xff]  ;;  %v35_v8 = vld [vmem:[%s523_s0 + $0x68] sm:$0xff]  ;;  %v36_v11 = vld [vmem:[%s523_s0 + $0x70] sm:$0xff] }
   0x7   :  { %299 = vmatpush.xpose.msk.msra.mxu0 %vm46_vm0, %v40_v1  ;;  %v23_v9 = vld [vmem:[%s523_s0 + $0x8] sm:$0xff]  ;;  %v30_v10 = vld [vmem:[%s523_s0 + $0x40] sm:$0xff]  ;;  %v24_v12 = vld [vmem:[%s523_s0 + $0x10] sm:$0xff] }
   0x8   :  { %v31_v13 = vld [vmem:[%s523_s0 + $0x48] sm:$0xff]  ;;  %v37_v14 = vld [vmem:[%s523_s0 + $0x78] sm:$0xff]  ;;  %v32_v16 = vld [vmem:[%s523_s0 + $0x50] sm:$0xff] }
   0x9   :  { %v25_v15 = vld [vmem:[%s523_s0 + $0x18] sm:$0xff]  ;;  %v26_v17 = vld [vmem:[%s523_s0 + $0x20] sm:$0xff]  ;;  %v27_v19 = vld [vmem:[%s523_s0 + $0x28] sm:$0xff] }
   0xa   :  { %339 = vmatpush.xpose.msk.msra.mxu2 %vm46_vm0, %v39_v2  ;;  %340 = vmatpush.xpose.msk.msra.mxu3 %vm46_vm0, %v39_v2  ;;  %v33_v18 = vld [vmem:[%s523_s0 + $0x58] sm:$0xff]  ;;  %v344_v28 = vld [vmem:[%s525_s2] ss:$0 sm:$0xff] }
   0xb   :  { %300 = vmatpush.xpose.msk.msra.mxu0 %vm46_vm0, %v39_v2 }
   0xe   :  { %341 = vmatpush.xpose.msk.msra.mxu2 %vm46_vm0, %v38_v3  ;;  %342 = vmatpush.xpose.msk.msra.mxu3 %vm46_vm0, %v38_v3 }
   0xf   :  { %301 = vmatpush.xpose.msk.msra.mxu0 %vm46_vm0, %v38_v3 }
  0x11   :  { %308 = vmatmul.msk.f32.vlgmr.msra.gmra.mxu2 %vm46_vm0, %v28_v4  ;;  %314 = vmatmul.msk.f32.vlgmr.msra.gmra.mxu3 %vm46_vm0, %v34_v5  ;;  %v188_v5 = vld [vmem:[%s526_s3] sm:$0x1]  ;;  %s375_s3 = smov [#allocation3]  }
  0x12   :  { %302 = vmatmul.msk.f32.vlgmr.msra.gmra.mxu0 %vm46_vm0, %v22_v6  ;;  %v190_v6 = vstv %s527_s4  ;;  %s287_s10 = sshll.u32 %s375_s3, 4  ;;  %s289_s4 = sshll.u32 %s528_s5, 4  ;;  %s288_s10 = int_to_ptr.vmem [resolvable:$true] %s287_s10  ;;  %s290_s4 = int_to_ptr.hbm [resolvable:$true] %s289_s4 }
  0x19   :  { %309 = vmatmul.msk.f32.gmra.mxu2 %vm46_vm0, %v29_v7  ;;  %315 = vmatmul.msk.f32.gmra.mxu3 %vm46_vm0, %v35_v8 }
  0x1a   :  { %303 = vmatmul.msk.f32.gmra.mxu0 %vm46_vm0, %v23_v9 }
  0x21   :  { %310 = vmatmul.msk.f32.gmra.mxu2 %vm46_vm0, %v30_v10  ;;  %316 = vmatmul.msk.f32.gmra.mxu3 %vm46_vm0, %v36_v11 }
  0x22   :  { %304 = vmatmul.msk.f32.gmra.mxu0 %vm46_vm0, %v24_v12 }
  0x29   :  { %311 = vmatmul.msk.f32.gmra.mxu2 %vm46_vm0, %v31_v13  ;;  %317 = vmatmul.msk.f32.gmra.mxu3 %vm46_vm0, %v37_v14 }
  0x2a   :  { %305 = vmatmul.msk.f32.gmra.mxu0 %vm46_vm0, %v25_v15 }
  0x31   :  { %312 = vmatmul.msk.f32.gmra.mxu2 %vm46_vm0, %v32_v16 }
  0x32   :  { %306 = vmatmul.msk.f32.gmra.mxu0 %vm46_vm0, %v26_v17 }
  0x39   :  { %313 = vmatmul.msk.f32.gmra.mxu2 %vm46_vm0, %v33_v18 }
  0x3a   :  { %307 = vmatmul.msk.f32.gmra.mxu0 %vm46_vm0, %v27_v19 }
  0x8f   :  { %v124_v22 = vpop.f32.mrf.mxu0 }
  0x90   :  { %v125_v2 = vadd.f32 %v344_v28, %v124_v22 }
  0x92   :  { %v172_v4 = vmax.f32 %v125_v2, 0.0 }
  0x94   :  { %v142_v20 = vpop.f32.mrf.mxu2  ;;  %v160_v21 = vpop.f32.mrf.mxu3 }
  0x95   :  { %v161_v38 = vadd.f32 %v344_v28, %v160_v21  ;;  %v143_v54 = vadd.f32 %v344_v28, %v142_v20 }
  0x97   :  { %v127_v27 = vpop.f32.mrf.mxu0  ;;  %v184_v41 = vmax.f32 %v161_v38, 0.0  ;;  %v178_v57 = vmax.f32 %v143_v54, 0.0 }
  0x98   :  { %v128_v0 = vadd.f32 %v344_v28, %v127_v27 }
  0x9a   :  { %v173_v3 = vmax.f32 %v128_v0, 0.0 }
  0x9c   :  { %v145_v23 = vpop.f32.mrf.mxu2  ;;  %v163_v24 = vpop.f32.mrf.mxu3 }
  0x9d   :  { %v164_v35 = vadd.f32 %v344_v28, %v163_v24  ;;  %v146_v51 = vadd.f32 %v344_v28, %v145_v23 }
  0x9f   :  { %v130_v34 = vpop.f32.mrf.mxu0  ;;  %v185_v39 = vmax.f32 %v164_v35, 0.0  ;;  %v179_v55 = vmax.f32 %v146_v51, 0.0 }
  0xa0   :  { %v131_v62 = vadd.f32 %v344_v28, %v130_v34 }
  0xa2   :  { %v174_v1 = vmax.f32 %v131_v62, 0.0 }
  0xa4   :  { %v148_v25 = vpop.f32.mrf.mxu2  ;;  %v166_v26 = vpop.f32.mrf.mxu3 }
  0xa5   :  { %v167_v32 = vadd.f32 %v344_v28, %v166_v26  ;;  %v149_v49 = vadd.f32 %v344_v28, %v148_v25 }
  0xa7   :  { %v186_v36 = vmax.f32 %v167_v32, 0.0  ;;  %v133_v40 = vpop.f32.mrf.mxu0  ;;  %v180_v52 = vmax.f32 %v149_v49, 0.0 }
  0xa8   :  { %v134_v60 = vadd.f32 %v344_v28, %v133_v40 }
  0xaa   :  { %v175_v63 = vmax.f32 %v134_v60, 0.0 }
  0xac   :  { %v151_v29 = vpop.f32.mrf.mxu2  ;;  %v169_v30 = vpop.f32.mrf.mxu3 }
  0xad   :  { %v170_v31 = vadd.f32 %v344_v28, %v169_v30  ;;  %v152_v46 = vadd.f32 %v344_v28, %v151_v29 }
  0xaf   :  { %v187_v33 = vmax.f32 %v170_v31, 0.0  ;;  %v136_v48 = vpop.f32.mrf.mxu0  ;;  %v181_v50 = vmax.f32 %v152_v46, 0.0 }
  0xb0   :  { %v137_v59 = vadd.f32 %v344_v28, %v136_v48 }
  0xb1   :  { %318 = vmatpush.xpose.msk.msra.mxu1 %vm46_vm0, %v187_v33 }
  0xb2   :  { %v176_v61 = vmax.f32 %v137_v59, 0.0 }
  0xb4   :  { %v154_v37 = vpop.f32.mrf.mxu2 }
  0xb5   :  { %319 = vmatpush.xpose.msk.msra.mxu1 %vm46_vm0, %v186_v36  ;;  %v155_v44 = vadd.f32 %v344_v28, %v154_v37 }
  0xb7   :  { %v182_v47 = vmax.f32 %v155_v44, 0.0  ;;  %v139_v53 = vpop.f32.mrf.mxu0 }
  0xb8   :  { %v140_v56 = vadd.f32 %v344_v28, %v139_v53 }
  0xb9   :  { %320 = vmatpush.xpose.msk.msra.mxu1 %vm46_vm0, %v185_v39 }
  0xba   :  { %v177_v58 = vmax.f32 %v140_v56, 0.0 }
  0xbc   :  { %v157_v42 = vpop.f32.mrf.mxu2 }
  0xbd   :  { %v158_v43 = vadd.f32 %v344_v28, %v157_v42  ;;  %321 = vmatpush.xpose.msk.msra.mxu1 %vm46_vm0, %v184_v41 }
  0xbf   :  { %v183_v45 = vmax.f32 %v158_v43, 0.0 }
  0xc1   :  { %322 = vmatpush.xpose.msk.msra.mxu1 %vm46_vm0, %v183_v45 }
  0xc5   :  { %323 = vmatpush.xpose.msk.msra.mxu1 %vm46_vm0, %v182_v47 }
  0xc9   :  { %324 = vmatpush.xpose.msk.msra.mxu1 %vm46_vm0, %v181_v50 }
  0xcd   :  { %325 = vmatpush.xpose.msk.msra.mxu1 %vm46_vm0, %v180_v52 }
  0xd1   :  { %326 = vmatpush.xpose.msk.msra.mxu1 %vm46_vm0, %v179_v55 }
  0xd5   :  { %327 = vmatpush.xpose.msk.msra.mxu1 %vm46_vm0, %v178_v57 }
  0xd9   :  { %328 = vmatpush.xpose.msk.msra.mxu1 %vm46_vm0, %v177_v58 }
  0xdd   :  { %329 = vmatpush.xpose.msk.msra.mxu1 %vm46_vm0, %v176_v61 }
  0xe1   :  { %330 = vmatpush.xpose.msk.msra.mxu1 %vm46_vm0, %v175_v63 }
  0xe5   :  { %331 = vmatpush.xpose.msk.msra.mxu1 %vm46_vm0, %v174_v1 }
  0xe9   :  { %332 = vmatpush.xpose.msk.msra.mxu1 %vm46_vm0, %v173_v3 }
  0xed   :  { %333 = vmatpush.xpose.msk.msra.mxu1 %vm46_vm0, %v172_v4 }
  0xf0   :  { %334 = vmatmul.msk.f32.vlgmr.msra.gmra.mxu1 %vm46_vm0, %v188_v5 }
 0x16d   :  { %v259_v7 = vpop.f32.mrf.mxu1 }
 0x16e   :  { %v260_v8 = vadd.f32 %v259_v7, %v190_v6 }
 0x170   :  { %v262_v9 = vsub.f32 0.0, %v260_v8 }
 0x172   :  { %v263_v10 = vmul.f32 1.442695, %v262_v9 }
 0x174   :  { %345 = vpow2.f32 %v263_v10 }
 0x17a   :  { %v346_v11 = vpop.eup %345 }
 0x17b   :  { %v265_v12 = vadd.f32 1.0, %v346_v11 }
 0x17d   :  { %347 = vrcp.f32 %v265_v12  ;;  %v277_v16 = vand.u32 2147483648, %v265_v12  ;;  %v275_v18 = vand.u32 2147483647, %v265_v12  ;;  %vm271_vm2 = vweird.f32 %v265_v12 }
 0x17f   :  { %v278_v20 = vor.u32 1.1754944e-38, %v277_v16  ;;  %vm276_vm4 = vcmp.eq.f32.partialorder %v275_v18, 8.507059e+37 }
 0x183   :  { %v348_v13 = vpop.eup %347 }
 0x184   :  { %v267_v14 = vmul.f32 %v348_v13, %v265_v12  ;;  %vm272_vm1 = vweird.f32 %v348_v13 }
 0x185   :  { %vm273_vm3 = vmor %vm271_vm2, %vm272_vm1 }
 0x186   :  { %v268_v15 = vsub.f32 1.0, %v267_v14 }
 0x188   :  { %v269_v17 = vmul.f32 %v348_v13, %v268_v15 }
 0x18a   :  { %v270_v19 = vadd.f32 %v348_v13, %v269_v17 }
 0x18c   :  { %v274_v21 = vsel %vm273_vm3, %v348_v13, %v270_v19 }
 0x18d   :  { %v279_v22 = vsel %vm276_vm4, %v278_v20, %v274_v21 }
 0x18e   :  { %281 = vst [vmem:[#allocation3] sm:$0x1] %v279_v22 }
 0x18f   :  { %292 = dma.vmem_to_hbm [thread:$0]  %s288_s10, 16, %s290_s4, [#allocation4]  }
 0x190   :  { %373 = dma.done.wait [#allocation4], 16  }
 0x191   :  { %374 = vsyncadd [#allocation4], 4294967280 }
 0x192   :  { %297 = vsyncpa [#allocation4], 1 }

</bundles_post_ra>
